<compile_context>
chip_gen: v7x
topology: tpu7x:2x2x1
jax: 0.10.0
libtpu: 0.0.40
codegen_flags: <defaults>
</compile_context>

<pallas_src>
import jax
import jax.numpy as jnp
from jax.experimental import pallas as pl
from jax.experimental.pallas import tpu as pltpu

NEG_SLOPE = 0.01          # F.leaky_relu default negative_slope
LANE = 128                # TPU lane width
MAX_TILE_B = 32768        # batch columns per grid step (per-step DMA ~1 MiB in, 1 MiB out)

D_IN, D_H1, D_H2, D_OUT = 5, 3, 5, 2

# Packed parameter slab (8, 12) -- fits one (8,128) vreg tile:
#   rows 0:3, cols 0:5   -> W1 (3,5)      rows 0:3, col 5  -> b1 (3,)
#   rows 3:8, cols 0:3   -> W2 (5,3)      rows 3:8, col 5  -> b2 (5,)
#   rows 0:2, cols 6:11  -> W3 (2,5)      rows 0:2, col 11 -> b3 (2,)
SLAB_ROWS, SLAB_COLS = 8, 12


def _leaky_relu(x):
    # Valid for 0 <= NEG_SLOPE <= 1: one mul + one max on the VPU.
    return jnp.maximum(x, NEG_SLOPE * x)


def mlp_kernel(p_ref, x_ref, o_ref):
    x = x_ref[...]          # (5, tile_b) -- batch on the lane axis (lane-dense)
    p = p_ref[...]          # (8, 12) packed params, resident across grid steps

    w1, b1 = p[0:3, 0:5], p[0:3, 5:6]        # fc1: (3,5), (3,1)
    w2, b2 = p[3:8, 0:3], p[3:8, 5:6]        # fc2: (5,3), (5,1)
    w3, b3 = p[0:2, 6:11], p[0:2, 11:12]     # fc3: (2,5), (2,1)

    # fc1 -> (dropout: identity in eval) -> leaky_relu
    h1 = _leaky_relu(jnp.dot(w1, x, preferred_element_type=jnp.float32) + b1)
    # fc2 -> (dropout: identity in eval) -> leaky_relu
    h2 = _leaky_relu(jnp.dot(w2, h1, preferred_element_type=jnp.float32) + b2)
    # fc3 -> leaky_relu
    h3 = _leaky_relu(jnp.dot(w3, h2, preferred_element_type=jnp.float32) + b3)

    o_ref[...] = h3.astype(o_ref.dtype)      # (2, tile_b), lane-dense stores


def pack_params(p):
    """Pack 6 PyTorch-layout tensors (W: (out,in), b: (out,)) into one (8,12) slab."""
    slab = jnp.zeros((SLAB_ROWS, SLAB_COLS), jnp.float32)
    slab = slab.at[0:3, 0:5].set(p["w1"]).at[0:3, 5].set(p["b1"])
    slab = slab.at[3:8, 0:3].set(p["w2"]).at[3:8, 5].set(p["b2"])
    slab = slab.at[0:2, 6:11].set(p["w3"]).at[0:2, 11].set(p["b3"])
    return slab


def _round_up(x, m):
    return ((x + m - 1) // m) * m


def _choose_tiling(B):
    """tile_b balanced against padding; >= 2 tiles past one lane group (v7x TCs)."""
    if B <= LANE:
        return B, 1                                   # single full-extent block
    n = max(pl.cdiv(B, MAX_TILE_B), 2)                # >=2 so both v7x TCs stream
    tile_b = _round_up(pl.cdiv(B, n), LANE)           # bound padding by 128*n_tiles
    return tile_b, pl.cdiv(B, tile_b)


def mlp_forward_fm(x_fm, slab):
    """Fast path. x_fm: (5, B) float32 (feature-major). Returns (2, B) float32.

    No wrapper-side relayouts: the caller supplies / consumes feature-major data.
    """
    B = x_fm.shape[1]
    tile_b, n_tiles = _choose_tiling(B)

    flops = 2 * B * (D_IN * D_H1 + D_H1 * D_H2 + D_H2 * D_OUT)
    bytes_accessed = 4 * (B * (D_IN + D_OUT) + SLAB_ROWS * SLAB_COLS)

    return pl.pallas_call(
        mlp_kernel,
        out_shape=jax.ShapeDtypeStruct((D_OUT, B), jnp.float32),
        grid=(n_tiles,),
        in_specs=[
            # params: one tiny DMA, same block every step -> stays resident in VMEM
            pl.BlockSpec((SLAB_ROWS, SLAB_COLS), lambda i: (0, 0)),
            # activations: streamed / double-buffered along the batch grid
            pl.BlockSpec((D_IN, tile_b), lambda i: (0, i)),
        ],
        out_specs=pl.BlockSpec((D_OUT, tile_b), lambda i: (0, i)),
        compiler_params=pltpu.CompilerParams(
            dimension_semantics=("parallel",)),   # lets v7x's 2 TCs split the batch
        cost_estimate=pl.CostEstimate(
            flops=flops, transcendentals=0, bytes_accessed=bytes_accessed),
    )(slab, x_fm)


def mlp_forward(x, slab):
    """PyTorch-layout compatibility wrapper. x: (B, 5) -> (B, 2).

    NOTE: the two transposes are extra XLA relayout passes over HBM; prefer
    mlp_forward_fm on the hot path.
    """
    return mlp_forward_fm(x.T, slab).T


def init_params(key):
    """PyTorch nn.Linear-style init: W (out,in), b (out,), U(-1/sqrt(in), 1/sqrt(in))."""
    ks = jax.random.split(key, 6)

    def linear(kw, kb, fan_in, fan_out):
        bound = 1.0 / jnp.sqrt(float(fan_in))
        w = jax.random.uniform(kw, (fan_out, fan_in), jnp.float32, -bound, bound)
        b = jax.random.uniform(kb, (fan_out,), jnp.float32, -bound, bound)
        return w, b

    w1, b1 = linear(ks[0], ks[1], D_IN, D_H1)
    w2, b2 = linear(ks[2], ks[3], D_H1, D_H2)
    w3, b3 = linear(ks[4], ks[5], D_H2, D_OUT)
    return {"w1": w1, "b1": b1, "w2": w2, "b2": b2, "w3": w3, "b3": b3}


def reference_forward(x, p):
    h1 = _leaky_relu(x @ p["w1"].T + p["b1"])
    h2 = _leaky_relu(h1 @ p["w2"].T + p["b2"])
    h3 = _leaky_relu(h2 @ p["w3"].T + p["b3"])
    return h3


if __name__ == "__main__":
    key = jax.random.PRNGKey(0)
    k_x, k_p, k_x2 = jax.random.split(key, 3)

    params = init_params(k_p)
    slab = pack_params(params)

    # Small shape consistent with the module: batch=8, in_features=5.
    B = 8
    x = jax.random.normal(k_x, (B, D_IN), dtype=jnp.float32)

    # Fast path: feature-major in/out, single full-extent block.
    out_fm = jax.block_until_ready(mlp_forward_fm(x.T, slab))
    ref = reference_forward(x, params)
    assert out_fm.shape == (D_OUT, B), out_fm.shape
    assert jnp.allclose(out_fm.T, ref, atol=1e-5, rtol=1e-5), "fast-path mismatch"

    # Compatibility path + multi-tile batch (2 grid steps, exercises the
    # "parallel" batch axis / TC split on v7x).
    B2 = 512
    x2 = jax.random.normal(k_x2, (B2, D_IN), dtype=jnp.float32)
    out2 = jax.block_until_ready(mlp_forward(x2, slab))
    ref2 = reference_forward(x2, params)
    assert out2.shape == (B2, D_OUT), out2.shape
    assert jnp.allclose(out2, ref2, atol=1e-5, rtol=1e-5), "compat-path mismatch"

    print("KERNEL_OK")
</pallas_src>

<mosaic_0001>
module attributes {stable_mosaic.version = 11 : i64} {
  func.func @mlp_kernel(%arg0: i32, %arg1: memref<8x12xf32, #tpu.memory_space<vmem>>, %arg2: memref<5x8xf32, #tpu.memory_space<vmem>>, %arg3: memref<2x8xf32, #tpu.memory_space<vmem>>) attributes {dimension_semantics = [#tpu.dimension_semantics<parallel>], iteration_bounds = array<i64: 1>, scalar_prefetch = 0 : i64, scratch_operands = 0 : i64, tpu.core_type = #tpu.core_type<tc>, window_params = [{pipeline_mode = #tpu.pipeline_mode<synchronous>, transform_indices = @transform_0, window_bounds = array<i64: 8, 12>}, {transform_indices = @transform_1, window_bounds = array<i64: 5, 8>}, {transform_indices = @transform_2, window_bounds = array<i64: 2, 8>}]} {
    %c0 = arith.constant 0 : index
    %c0_0 = arith.constant 0 : index
    %0 = vector.load %arg2[%c0, %c0_0] : memref<5x8xf32, #tpu.memory_space<vmem>>, vector<5x8xf32>
    %c0_1 = arith.constant 0 : index
    %c0_2 = arith.constant 0 : index
    %1 = vector.load %arg1[%c0_1, %c0_2] : memref<8x12xf32, #tpu.memory_space<vmem>>, vector<8x12xf32>
    %2 = vector.extract_strided_slice %1 {offsets = [0, 0], sizes = [3, 5], strides = [1, 1]} : vector<8x12xf32> to vector<3x5xf32>
    %3 = vector.extract_strided_slice %1 {offsets = [0, 5], sizes = [3, 1], strides = [1, 1]} : vector<8x12xf32> to vector<3x1xf32>
    %4 = vector.extract_strided_slice %1 {offsets = [3, 0], sizes = [5, 3], strides = [1, 1]} : vector<8x12xf32> to vector<5x3xf32>
    %5 = vector.extract_strided_slice %1 {offsets = [3, 5], sizes = [5, 1], strides = [1, 1]} : vector<8x12xf32> to vector<5x1xf32>
    %6 = vector.extract_strided_slice %1 {offsets = [0, 6], sizes = [2, 5], strides = [1, 1]} : vector<8x12xf32> to vector<2x5xf32>
    %7 = vector.extract_strided_slice %1 {offsets = [0, 11], sizes = [2, 1], strides = [1, 1]} : vector<8x12xf32> to vector<2x1xf32>
    %cst = arith.constant dense<0.000000e+00> : vector<3x8xf32>
    %8 = tpu.matmul %2, %0, %cst {dimension_numbers = #tpu.dot_dimension_numbers<[1], [0], [0], [1], [0, 0, 1, 1], [], []>} : vector<3x5xf32>, vector<5x8xf32>, vector<3x8xf32> -> vector<3x8xf32>
    %9 = vector.broadcast %3 : vector<3x1xf32> to vector<3x8xf32>
    %10 = arith.addf %8, %9 : vector<3x8xf32>
    %cst_3 = arith.constant 0.00999999977 : f32
    %11 = vector.broadcast %cst_3 : f32 to vector<3x8xf32>
    %12 = arith.mulf %11, %10 : vector<3x8xf32>
    %13 = arith.maximumf %10, %12 : vector<3x8xf32>
    %cst_4 = arith.constant dense<0.000000e+00> : vector<5x8xf32>
    %14 = tpu.matmul %4, %13, %cst_4 {dimension_numbers = #tpu.dot_dimension_numbers<[1], [0], [0], [1], [0, 0, 1, 1], [], []>} : vector<5x3xf32>, vector<3x8xf32>, vector<5x8xf32> -> vector<5x8xf32>
    %15 = vector.broadcast %5 : vector<5x1xf32> to vector<5x8xf32>
    %16 = arith.addf %14, %15 : vector<5x8xf32>
    %cst_5 = arith.constant 0.00999999977 : f32
    %17 = vector.broadcast %cst_5 : f32 to vector<5x8xf32>
    %18 = arith.mulf %17, %16 : vector<5x8xf32>
    %19 = arith.maximumf %16, %18 : vector<5x8xf32>
    %cst_6 = arith.constant dense<0.000000e+00> : vector<2x8xf32>
    %20 = tpu.matmul %6, %19, %cst_6 {dimension_numbers = #tpu.dot_dimension_numbers<[1], [0], [0], [1], [0, 0, 1, 1], [], []>} : vector<2x5xf32>, vector<5x8xf32>, vector<2x8xf32> -> vector<2x8xf32>
    %21 = vector.broadcast %7 : vector<2x1xf32> to vector<2x8xf32>
    %22 = arith.addf %20, %21 : vector<2x8xf32>
    %cst_7 = arith.constant 0.00999999977 : f32
    %23 = vector.broadcast %cst_7 : f32 to vector<2x8xf32>
    %24 = arith.mulf %23, %22 : vector<2x8xf32>
    %25 = arith.maximumf %22, %24 : vector<2x8xf32>
    %c0_8 = arith.constant 0 : index
    %c0_9 = arith.constant 0 : index
    %26 = vector.load %arg3[%c0_8, %c0_9] : memref<2x8xf32, #tpu.memory_space<vmem>>, vector<2x8xf32>
    tpu.vector_store %arg3[%c0_8, %c0_9], %25 {strides = array<i32>} : memref<2x8xf32, #tpu.memory_space<vmem>>, vector<2x8xf32>,
    return
  }
  func.func @transform_0(%arg0: i32) -> (i32, i32) {
    %c0_i32 = arith.constant 0 : i32
    %c0_i32_0 = arith.constant 0 : i32
    %c0_i32_1 = arith.constant 0 : i32
    return %c0_i32, %c0_i32_0 : i32, i32
  }
  func.func @transform_1(%arg0: i32) -> (i32, i32) {
    %c0_i32 = arith.constant 0 : i32
    %c0_i32_0 = arith.constant 0 : i32
    return %c0_i32, %arg0 : i32, i32
  }
  func.func @transform_2(%arg0: i32) -> (i32, i32) {
    %c0_i32 = arith.constant 0 : i32
    %c0_i32_0 = arith.constant 0 : i32
    return %c0_i32, %arg0 : i32, i32
  }
}

</mosaic_0001>

<bundles_post_ra>
// kernel: tpu_custom_call.1
= control target key start
LH: loop header
LB: loop body
LE: loop exit
PB: predicated region body
PF: predicated region fallthrough
CT: control target
= control target key end

     0   :  { %7 = vsyncpa [#allocation3], 0  ;;  %s478_s0 = inlined_call_operand.hbm [shape: f32[8,12], index: 0, kind: input, shape index: {}]   ;;  %s479_s1 = inlined_call_operand.hbm [shape: f32[5,8], index: 1, kind: input, shape index: {}]   ;;  %s480_s2 = inlined_call_operand.hbm [shape: f32[2,8], index: 2, kind: output, shape index: {}]  }
   0x1   :  { %8 = vsyncpa [#allocation6], 0 }
   0x2   :  { %9 = vsyncpa [#allocation4], 0  ;;  %s415_s9 = smov [#allocation2]   ;;  %s416_s11 = smov [#allocation5]  }
   0x3   :  { %s16_s10 = sshll.u32 %s415_s9, 4  ;;  %s26_s12 = sshll.u32 %s416_s11, 4  ;;  %s17_s10 = int_to_ptr.vmem [resolvable:$true] %s16_s10  ;;  %s27_s12 = int_to_ptr.vmem [resolvable:$true] %s26_s12 }
   0x4   :  { %s343_s15 = scalar_lea.hbm %s478_s0, 128 }
   0x5   :  { %p344_p0 = scmp.ne.s32.totalorder %s478_s0, %s343_s15  ;;  %p347_p1 = scmp.lt.u32.totalorder %s343_s15, %s478_s0 }
   0x7   :  { %p349_p2 = pnand %p347_p1, %p344_p0 }
   0x9   :  { %352 = shalt.err (!%p349_p2)
}
   0xa   :  { %s353_s20 = scalar_lea.vmem %s17_s10, 128  ;;  %p358_p4 = scmp.lt.s32.totalorder %s17_s10, %s17_s10 }
   0xb   :  { %p354_p3 = scmp.ne.s32.totalorder %s17_s10, %s353_s20  ;;  %p359_p5 = scmp.lt.s32.totalorder %s353_s20, %s353_s20 }
   0xd   :  { %p360_p6 = por %p359_p5, %p358_p4 }
   0xf   :  { %p361_p7 = pnand %p360_p6, %p354_p3 }
  0x11   :  { %364 = shalt.err (!%p361_p7)
}
  0x12   :  { %19 = dma.hbm_to_vmem [thread:$0]  %s478_s0, 128, %s17_s10, [#allocation3]  }
  0x13   :  { %s365_s25 = scalar_lea.hbm %s479_s1, 128 }
  0x14   :  { %p366_p8 = scmp.ne.s32.totalorder %s479_s1, %s365_s25  ;;  %p369_p9 = scmp.lt.u32.totalorder %s365_s25, %s479_s1 }
  0x16   :  { %p371_p10 = pnand %p369_p9, %p366_p8 }
  0x18   :  { %374 = shalt.err (!%p371_p10)
}
  0x19   :  { %s375_s30 = scalar_lea.vmem %s27_s12, 128  ;;  %p380_p12 = scmp.lt.s32.totalorder %s27_s12, %s27_s12 }
  0x1a   :  { %p376_p11 = scmp.ne.s32.totalorder %s27_s12, %s375_s30  ;;  %p381_p13 = scmp.lt.s32.totalorder %s375_s30, %s375_s30 }
  0x1c   :  { %p382_p0 = por %p381_p13, %p380_p12 }
  0x1e   :  { %p383_p1 = pnand %p382_p0, %p376_p11 }
  0x20   :  { %386 = shalt.err (!%p383_p1)
}
  0x21   :  { %29 = dma.hbm_to_vmem [thread:$0]  %s479_s1, 128, %s27_s12, [#allocation6]  }
  0x22   :  { %409 = dma.done.wait [#allocation3], 128  }
  0x23   :  { %410 = vsyncadd [#allocation3], 4294967168 }
  0x24   :  { %411 = dma.done.wait [#allocation6], 128  }
  0x25   :  { %412 = vsyncadd [#allocation6], 4294967168  ;;  %v417_v0 = vmov 0.0   ;;  %vm418_vm0 = vmmov 0   ;;  %v419_v1 = vmov 5   ;;  %vm46_vm1 = vcmask 1044480  }
  0x26   :  { %317 = vmatprep.subr.mxu0 %v417_v0  ;;  %319 = vmatprep.mubr.msk.f32.mxu0 %vm418_vm0, %v417_v0  ;;  %vm43_vm2 = vcmask 39936   ;;  %v36_v2 = vld [vmem:[#allocation5] sm:$0x1f]  ;;  %v37_v3 = vld [vmem:[#allocation2] sm:$0xff]  ;;  %s420_s1 = smov 122   ;;  %vm128_vm3 = vcmask 1042432  }
  0x27   :  { %340 = vset.pattern.permute.xlu0 %v419_v1  ;;  %322 = vmatprep.subr.mxu1 %v417_v0  ;;  %v122_v9 = vrot.slane %v37_v3, 3  ;;  %vm125_vm4 = vcmask 23552   ;;  %v421_v11 = vmov 11   ;;  %s422_s4 = smov [#allocation7]   ;;  %vm287_vm5 = vcmask 58368  }
  0x28   :  { %324 = vmatprep.mubr.msk.f32.mxu1 %vm418_vm0, %v417_v0  ;;  %318 = vmatpush3.msk.msra.mxu0 %vm46_vm1, %v36_v2  ;;  %s295_s5 = sshll.u32 %s422_s4, 4  ;;  %s296_s5 = int_to_ptr.vmem [resolvable:$true] %s295_s5 }
  0x29   :  { %40 = vperm.xlu0 %340, %v37_v3   ;;  %320 = vmatmul.mubr.msk.f32.vlgmr.msra.gmra.mrb[0].mxu0 %vm43_vm2, %v37_v3  ;;  %s387_s6 = scalar_lea.vmem %s296_s5, 32  ;;  %p392_p3 = scmp.lt.s32.totalorder %s296_s5, %s296_s5 }
  0x2a   :  { %327 = vmatprep.subr.mxu0 %v417_v0  ;;  %329 = vmatprep.mubr.msk.f32.mxu0 %vm418_vm0, %v417_v0  ;;  %p388_p2 = scmp.ne.s32.totalorder %s296_s5, %s387_s6  ;;  %p393_p4 = scmp.lt.s32.totalorder %s387_s6, %s387_s6 }
  0x2b   :  { %341 = vset.pattern.permute.xlu1 %v421_v11 }
  0x2c   :  { %205 = vperm.xlu1 %341, %v37_v3   ;;  %p394_p5 = por %p393_p4, %p392_p3 }
  0x2d   :  { %208 = vrot.lane.b32.xlu0 %v37_v3, %s420_s1 }
  0x2e   :  { %342 = vset.pattern.permute.xlu0 %v421_v11  ;;  %p395_p6 = pnand %p394_p5, %p388_p2 }
  0xa8   :  { %v41_v4 = vpop.permute.xlu0 %40 }
  0xa9   :  { %v123_v12 = vrot.slane %v41_v4, 3 }
  0xab   :  { %v206_v19 = vpop.permute.xlu1 %205 }
  0xac   :  { %v209_v18 = vpop.permute.xlu0 %208 }
  0xfc   :  { %v116_v5 = vpop.f32.mrb[0].mxu0 }
  0xfd   :  { %v117_v6 = vadd.f32 %v116_v5, %v41_v4  ;;  %v321_v7 = vpop.f32.mrb[1].mxu0 }
  0xff   :  { %v120_v8 = vmul.f32 0.01, %v117_v6 }
 0x101   :  { %v121_v10 = vmax.f32 %v117_v6, %v120_v8 }
 0x103   :  { %323 = vmatpush3.msk.msra.mxu1 %vm128_vm3, %v121_v10 }
 0x104   :  { %325 = vmatmul.mubr.msk.f32.vlgmr.msra.gmra.mrb[0].mxu1 %vm125_vm4, %v122_v9 }
 0x1d7   :  { %v198_v13 = vpop.f32.mrb[0].mxu1 }
 0x1d8   :  { %v199_v14 = vadd.f32 %v198_v13, %v123_v12  ;;  %v326_v15 = vpop.f32.mrb[1].mxu1 }
 0x1da   :  { %v202_v16 = vmul.f32 0.01, %v199_v14 }
 0x1dc   :  { %v203_v17 = vmax.f32 %v199_v14, %v202_v16 }
 0x1de   :  { %328 = vmatpush3.msk.msra.mxu0 %vm46_vm1, %v203_v17 }
 0x1df   :  { %330 = vmatmul.mubr.msk.f32.vlgmr.msra.gmra.mrb[2].mxu0 %vm43_vm2, %v209_v18 }
 0x2b2   :  { %v281_v20 = vpop.f32.mrb[2].mxu0 }
 0x2b3   :  { %v282_v21 = vadd.f32 %v281_v20, %v206_v19  ;;  %v331_v22 = vpop.f32.mrb[3].mxu0 }
 0x2b5   :  { %v285_v23 = vmul.f32 0.01, %v282_v21 }
 0x2b7   :  { %v286_v24 = vmax.f32 %v282_v21, %v285_v23 }
 0x2b9   :  { %288 = vst.msk [vmem:[#allocation7] sm:$0x3] %vm287_vm5, %v286_v24 }
 0x2ba   :  { %398 = shalt.err (!%p395_p6)
}
 0x2bb   :  { %s399_s9 = scalar_lea.hbm %s480_s2, 32 }
 0x2bc   :  { %p400_p7 = scmp.ne.s32.totalorder %s480_s2, %s399_s9  ;;  %p403_p8 = scmp.lt.u32.totalorder %s399_s9, %s480_s2 }
 0x2be   :  { %p405_p9 = pnand %p403_p8, %p400_p7 }
 0x2c0   :  { %408 = shalt.err (!%p405_p9)
}
 0x2c1   :  { %298 = dma.vmem_to_hbm [thread:$0]  %s296_s5, 32, %s480_s2, [#allocation4]  }
 0x2c2   :  { %413 = dma.done.wait [#allocation4], 32  }
 0x2c3   :  { %414 = vsyncadd [#allocation4], 4294967264 }
 0x2c4   :  { %302 = vsyncpa [#allocation3], 1 }
 0x2c5   :  { %303 = vsyncpa [#allocation6], 1 }
 0x2c6   :  { %304 = vsyncpa [#allocation4], 1 }

</bundles_post_ra>
